<compile_context>
chip_gen: v5e
topology: v5e:2x2
jax: 0.10.0
libtpu: 0.0.40
codegen_flags: <defaults>
</compile_context>

<pallas_src>
import math
from functools import partial

import jax
import jax.numpy as jnp
from jax import lax
from jax.experimental import pallas as pl
from jax.experimental.pallas import tpu as pltpu


def _softplus_f32(x):
    # Numerically stable softplus in f32: max(x, 0) + log1p(exp(-|x|)).
    x = x.astype(jnp.float32)
    return jnp.maximum(x, 0.0) + jnp.log1p(jnp.exp(-jnp.abs(x)))


# ---------------------------------------------------------------------------
# Kernel 1: elementwise softplus(W^T) + cast to the MXU feed dtype.
# Run once per call when gm > 1 so the matmul kernel never redoes EUP work
# and (when bf16) the weight stream is half-width.
# ---------------------------------------------------------------------------
def _softplus_cast_kernel(w_ref, o_ref):
    o_ref[...] = _softplus_f32(w_ref[...]).astype(o_ref.dtype)


def _ew_block(dim):
    if dim <= 1024:
        return dim
    for b in (1024, 512, 256, 128):
        if dim % b == 0:
            return b
    return 128


def _softplus_cast(w_padded, out_dtype):
    k_pad, n_pad = w_padded.shape
    bk, bn = _ew_block(k_pad), _ew_block(n_pad)
    return pl.pallas_call(
        _softplus_cast_kernel,
        out_shape=jax.ShapeDtypeStruct((k_pad, n_pad), out_dtype),
        grid_spec=pltpu.PrefetchScalarGridSpec(
            num_scalar_prefetch=0,
            grid=(k_pad // bk, n_pad // bn),
            in_specs=[pl.BlockSpec((bk, bn), lambda i, j: (i, j))],
            out_specs=pl.BlockSpec((bk, bn), lambda i, j: (i, j)),
        ),
        compiler_params=pltpu.CompilerParams(
            dimension_semantics=("parallel", "parallel")),
    )(w_padded)


# ---------------------------------------------------------------------------
# Kernel 2: tiled matmul  out[i,j] = sum_k x[i,k] @ w[k,j] + bias[j]
#   x: (tm, tk) in the MXU dtype; w: (tk, tn) (softplus'ed already, or raw
#   with apply_softplus=True); bias: (1, tn) f32; out: (tm, tn).
# ---------------------------------------------------------------------------
def _positive_linear_kernel(x_ref, w_ref, b_ref, o_ref, *scratch,
                            num_k, apply_softplus, acc_in_out):
    k = pl.program_id(2)

    x = x_ref[...]
    w = w_ref[...]
    if apply_softplus:
        # Fused path (single batch tile): softplus in f32 (v5e EUP has no
        # bf16), then cast to the MXU feed dtype (== x.dtype).
        w = _softplus_f32(w).astype(x.dtype)

    contrib = jnp.dot(x, w, preferred_element_type=jnp.float32)

    if acc_in_out:
        # f32 output: accumulate straight into the resident output block
        # (saves the acc scratch and the finalize copy).
        @pl.when(k == 0)
        def _():
            o_ref[...] = contrib

        @pl.when(k > 0)
        def _():
            o_ref[...] += contrib

        @pl.when(k == num_k - 1)
        def _():
            o_ref[...] += b_ref[...]
    else:
        acc_ref = scratch[0]

        @pl.when(k == 0)
        def _():
            acc_ref[...] = contrib

        @pl.when(k > 0)
        def _():
            acc_ref[...] += contrib

        @pl.when(k == num_k - 1)
        def _():
            o_ref[...] = (acc_ref[...] + b_ref[...]).astype(o_ref.dtype)


# ---------------------------------------------------------------------------
# Wrapper
# ---------------------------------------------------------------------------
def _pad2(a, rows, cols):
    r, c = a.shape
    if r == rows and c == cols:          # skip the pad copy when aligned
        return a
    return jnp.pad(a, ((0, rows - r), (0, cols - c)))


def _fit_tile(dim, target, align):
    """Pick a tile (multiple of `align`) and the padded dim it divides evenly."""
    target = max(align, -(-target // align) * align)
    padded = -(-dim // align) * align
    if padded <= target:
        return padded, padded            # one tile covers the whole dim
    return target, -(-dim // target) * target


def positive_linear(x, weight, bias=None, *,
                    tm=256, tn=256, tk=512,
                    mxu_dtype=None,
                    precompute_softplus=None,
                    weight_resident_bytes=8 * 1024 * 1024,
                    vmem_limit_bytes=32 * 1024 * 1024):
    """x: (..., IN), weight: (OUT, IN), bias: (OUT,) or None -> (..., OUT)."""
    *lead, in_features = x.shape
    out_features, in_w = weight.shape
    assert in_w == in_features
    x2 = x.reshape(-1, in_features)
    m = x2.shape[0]
    out_dtype = x2.dtype

    # MXU feed dtype: bf16 by default for non-trivial shapes (2-3x MXU
    # throughput on all generations; f32 operands are decomposed into several
    # bf16 passes anyway). Accumulation is always f32.
    if mxu_dtype is None:
        if out_dtype == jnp.bfloat16 or m * in_features * out_features >= (1 << 20):
            mxu_dtype = jnp.bfloat16
        else:
            mxu_dtype = jnp.float32
    mxu_dtype = jnp.dtype(mxu_dtype)
    mxu_is_bf16 = mxu_dtype == jnp.dtype(jnp.bfloat16)

    if bias is None:
        bias = jnp.zeros((out_features,), dtype=jnp.float32)

    m_align = 16 if mxu_is_bf16 else 8          # bf16 packs 16 sublanes/vreg
    tm_, m_pad = _fit_tile(m, tm, m_align)
    gm = m_pad // tm_

    if precompute_softplus is None:
        # Only pays off when several batch tiles revisit the same weight.
        precompute_softplus = gm > 1

    # Minimal lane-aligned weight padding (used for the residency decision).
    n_pad128 = -(-out_features // 128) * 128
    k_pad128 = -(-in_features // 128) * 128
    w_itemsize = 2 if (precompute_softplus and mxu_is_bf16) else 4
    w_bytes = n_pad128 * k_pad128 * w_itemsize
    resident_w = (precompute_softplus
                  and w_bytes <= weight_resident_bytes
                  and n_pad128 <= 2048 and k_pad128 <= 2048)

    if resident_w:
        # Whole padded weight = one tile: the weight BlockSpec index never
        # changes, so softplus(W^T) is DMA'd from HBM exactly once and stays
        # VMEM-resident across all batch tiles (and gk == 1 -> no K loop).
        tn_, n_pad = n_pad128, n_pad128
        tk_, k_pad = k_pad128, k_pad128
    else:
        tn_, n_pad = _fit_tile(out_features, tn, 128)   # lane-dense output
        tk_, k_pad = _fit_tile(in_features, tk, 128)
    gn, gk = n_pad // tn_, k_pad // tk_

    # Cast x to the MXU dtype in the wrapper (halves its DMA bytes / VMEM
    # tile when bf16), then zero-pad only if needed. x's zero-padded K
    # columns cancel the softplus(0)=0.693 rows of the padded weight; padded
    # OUT columns are junk that is sliced off (wasted MXU work only).
    if x2.dtype != mxu_dtype:
        x2 = x2.astype(mxu_dtype)
    xp = _pad2(x2, m_pad, k_pad)

    # Weight handed to the kernel as W^T (IN, OUT): plain (tm,tk)x(tk,tn) dot.
    wT = weight.T
    if precompute_softplus:
        w_fed = _softplus_cast(
            _pad2(wT.astype(jnp.float32), k_pad, n_pad), mxu_dtype)
        apply_softplus = False
    else:
        w_fed = _pad2(wT, k_pad, n_pad)          # raw; softplus fused in kernel
        apply_softplus = True

    bp = _pad2(bias.astype(jnp.float32).reshape(1, out_features), 1, n_pad)

    acc_in_out = jnp.dtype(out_dtype) == jnp.dtype(jnp.float32)
    scratch_shapes = [] if acc_in_out else [pltpu.VMEM((tm_, tn_), jnp.float32)]

    kernel = partial(_positive_linear_kernel, num_k=gk,
                     apply_softplus=apply_softplus, acc_in_out=acc_in_out)

    out_padded = pl.pallas_call(
        kernel,
        out_shape=jax.ShapeDtypeStruct((m_pad, n_pad), out_dtype),
        grid_spec=pltpu.PrefetchScalarGridSpec(
            num_scalar_prefetch=0,
            grid=(gm, gn, gk),
            in_specs=[
                pl.BlockSpec((tm_, tk_), lambda i, j, k: (i, k)),   # x
                pl.BlockSpec((tk_, tn_), lambda i, j, k: (k, j)),   # W^T (maybe softplus'ed)
                pl.BlockSpec((1, tn_), lambda i, j, k: (0, j)),     # bias
            ],
            out_specs=pl.BlockSpec((tm_, tn_), lambda i, j, k: (i, j)),
            scratch_shapes=scratch_shapes,
        ),
        compiler_params=pltpu.CompilerParams(
            # Both non-reduction axes parallel -> shards across v7x's 2 TCs
            # (no cache-fill gating anymore); no-op on single-TC v5e/v6e.
            dimension_semantics=("parallel", "parallel", "arbitrary"),
            # v7x-safe; raise to 64-96 MiB on v5e/v6e when sweeping big tiles.
            vmem_limit_bytes=vmem_limit_bytes,
        ),
    )(xp, w_fed, bp)

    out = out_padded
    if m_pad != m or n_pad != out_features:
        out = out[:m, :out_features]
    return out.reshape(*lead, out_features)


def init_positive_linear_params(key, in_features, out_features, weight_init_offset=-2):
    """Deterministic init matching PositiveLinear.reset_parameters()."""
    kw, kb = jax.random.split(key)
    fan_in = in_features
    w_bound = 1.0 / math.sqrt(fan_in)          # kaiming_uniform_(a=sqrt(5))
    weight = jax.random.uniform(
        kw, (out_features, in_features), jnp.float32, -w_bound, w_bound
    ) + weight_init_offset
    b_bound = 1.0 / math.sqrt(fan_in) if fan_in > 0 else 0.0
    bias = jax.random.uniform(kb, (out_features,), jnp.float32, -b_bound, b_bound)
    return weight, bias


if __name__ == "__main__":
    key = jax.random.PRNGKey(0)
    ks = jax.random.split(key, 8)

    def ref_fn(x2d, w, b):
        return jnp.dot(x2d.astype(jnp.float32), jax.nn.softplus(w).T,
                       precision=lax.Precision.HIGHEST) + b

    # Case 1: tiny GammaNetwork-style layer, leading batch dims, fused
    # single-tile f32 path (gm == gn == gk == 1).
    x1 = jax.random.normal(ks[0], (2, 4, 32), jnp.float32)
    w1, b1 = init_positive_linear_params(ks[1], 32, 16)
    y1 = jax.block_until_ready(positive_linear(x1, w1, b1))
    r1 = ref_fn(x1.reshape(-1, 32), w1, b1).reshape(2, 4, 16)
    assert y1.shape == (2, 4, 16)
    assert jnp.allclose(y1, r1, atol=1e-5, rtol=1e-5), "case 1 mismatch"

    # Case 2: gm > 1 -> precomputed softplus(W^T), VMEM-resident whole-weight
    # block, explicit f32 MXU feed, accumulate-into-output path.
    x2 = jax.random.normal(ks[2], (24, 384), jnp.float32)
    w2, b2 = init_positive_linear_params(ks[3], 384, 272)
    r2 = ref_fn(x2, w2, b2)
    y2 = jax.block_until_ready(
        positive_linear(x2, w2, b2, tm=8, mxu_dtype=jnp.float32))
    assert y2.shape == (24, 272)
    assert jnp.allclose(y2, r2, atol=1e-4, rtol=1e-4), "case 2 mismatch"

    # Case 3: same shapes, auto bf16 MXU feed (f32 accumulate), resident bf16
    # softplus weight, f32 output.
    y3 = jax.block_until_ready(positive_linear(x2, w2, b2, tm=16))
    assert y3.dtype == jnp.float32
    assert jnp.allclose(y3, r2, atol=1e-1, rtol=1e-1), "case 3 mismatch"

    # Case 4: bf16 input/output, non-resident (tiled) precomputed weight,
    # K accumulation through the f32 scratch accumulator.
    x4 = x2.astype(jnp.bfloat16)
    y4 = jax.block_until_ready(
        positive_linear(x4, w2, b2, tm=16, tn=128, tk=128,
                        weight_resident_bytes=0))
    assert y4.dtype == jnp.bfloat16
    assert jnp.allclose(y4.astype(jnp.float32), r2, atol=1.5e-1, rtol=1.5e-1), \
        "case 4 mismatch"

    # Case 5: gm == 1 with a multi-tile (gn, gk) grid -> softplus fused in the
    # matmul kernel, K accumulation directly into the f32 output block.
    x5 = jax.random.normal(ks[4], (8, 384), jnp.float32)
    r5 = ref_fn(x5, w2, b2)
    y5 = jax.block_until_ready(
        positive_linear(x5, w2, b2, tn=128, tk=128, mxu_dtype=jnp.float32))
    assert jnp.allclose(y5, r5, atol=1e-4, rtol=1e-4), "case 5 mismatch"

    print("KERNEL_OK")
</pallas_src>

<mosaic_0001>
module attributes {stable_mosaic.version = 11 : i64} {
  func.func @_positive_linear_kernel(%arg0: i32, %arg1: i32, %arg2: i32, %arg3: memref<8x128xf32, #tpu.memory_space<vmem>>, %arg4: memref<128x128xf32, #tpu.memory_space<vmem>>, %arg5: memref<1x128xf32, #tpu.memory_space<vmem>>, %arg6: memref<8x128xf32, #tpu.memory_space<vmem>>) attributes {dimension_semantics = [#tpu.dimension_semantics<parallel>, #tpu.dimension_semantics<parallel>, #tpu.dimension_semantics<arbitrary>], iteration_bounds = array<i64: 1, 1, 1>, scalar_prefetch = 0 : i64, scratch_operands = 0 : i64, tpu.core_type = #tpu.core_type<tc>, window_params = [{transform_indices = @transform_0, window_bounds = array<i64: 8, 128>}, {transform_indices = @transform_1, window_bounds = array<i64: 128, 128>}, {transform_indices = @transform_2, window_bounds = array<i64: 1, 128>}, {transform_indices = @transform_3, window_bounds = array<i64: 8, 128>}]} {
    %c0 = arith.constant 0 : index
    %c0_0 = arith.constant 0 : index
    %0 = vector.load %arg3[%c0, %c0_0] : memref<8x128xf32, #tpu.memory_space<vmem>>, vector<8x128xf32>
    %c0_1 = arith.constant 0 : index
    %c0_2 = arith.constant 0 : index
    %1 = vector.load %arg4[%c0_1, %c0_2] : memref<128x128xf32, #tpu.memory_space<vmem>>, vector<128x128xf32>
    %cst = arith.constant 0.000000e+00 : f32
    %2 = vector.broadcast %cst : f32 to vector<128x128xf32>
    %3 = arith.maximumf %1, %2 : vector<128x128xf32>
    %4 = math.absf %1 : vector<128x128xf32>
    %cst_3 = arith.constant 0.000000e+00 : f32
    %5 = vector.broadcast %cst_3 : f32 to vector<128x128xf32>
    %6 = arith.subf %5, %4 : vector<128x128xf32>
    %7 = math.exp %6 : vector<128x128xf32>
    %8 = math.log1p %7 : vector<128x128xf32>
    %9 = arith.addf %3, %8 : vector<128x128xf32>
    %cst_4 = arith.constant dense<0.000000e+00> : vector<8x128xf32>
    %10 = tpu.matmul %0, %9, %cst_4 {dimension_numbers = #tpu.dot_dimension_numbers<[1], [0], [0], [1], [0, 0, 1, 1], [], []>} : vector<8x128xf32>, vector<128x128xf32>, vector<8x128xf32> -> vector<8x128xf32>
    %c0_i32 = arith.constant 0 : i32
    %11 = arith.cmpi eq, %arg2, %c0_i32 : i32
    %12 = arith.extui %11 : i1 to i32
    %c0_i32_5 = arith.constant 0 : i32
    %13 = arith.cmpi ne, %12, %c0_i32_5 : i32
    scf.if %13 {
      %c0_10 = arith.constant 0 : index
      %c0_11 = arith.constant 0 : index
      %20 = vector.load %arg6[%c0_10, %c0_11] : memref<8x128xf32, #tpu.memory_space<vmem>>, vector<8x128xf32>
      tpu.vector_store %arg6[%c0_10, %c0_11], %10 {strides = array<i32>} : memref<8x128xf32, #tpu.memory_space<vmem>>, vector<8x128xf32>,
    } else {
    }
    %c0_i32_6 = arith.constant 0 : i32
    %14 = arith.cmpi sgt, %arg2, %c0_i32_6 : i32
    %15 = arith.extui %14 : i1 to i32
    %c0_i32_7 = arith.constant 0 : i32
    %16 = arith.cmpi ne, %15, %c0_i32_7 : i32
    scf.if %16 {
      %c0_10 = arith.constant 0 : index
      %c0_11 = arith.constant 0 : index
      %20 = vector.load %arg6[%c0_10, %c0_11] : memref<8x128xf32, #tpu.memory_space<vmem>>, vector<8x128xf32>
      %21 = arith.addf %20, %10 : vector<8x128xf32>
      %c0_12 = arith.constant 0 : index
      %c0_13 = arith.constant 0 : index
      %22 = vector.load %arg6[%c0_12, %c0_13] : memref<8x128xf32, #tpu.memory_space<vmem>>, vector<8x128xf32>
      tpu.vector_store %arg6[%c0_12, %c0_13], %21 {strides = array<i32>} : memref<8x128xf32, #tpu.memory_space<vmem>>, vector<8x128xf32>,
    } else {
    }
    %c0_i32_8 = arith.constant 0 : i32
    %17 = arith.cmpi eq, %arg2, %c0_i32_8 : i32
    %18 = arith.extui %17 : i1 to i32
    %c0_i32_9 = arith.constant 0 : i32
    %19 = arith.cmpi ne, %18, %c0_i32_9 : i32
    scf.if %19 {
      %c0_10 = arith.constant 0 : index
      %c0_11 = arith.constant 0 : index
      %20 = vector.load %arg6[%c0_10, %c0_11] : memref<8x128xf32, #tpu.memory_space<vmem>>, vector<8x128xf32>
      %c0_12 = arith.constant 0 : index
      %c0_13 = arith.constant 0 : index
      %21 = vector.load %arg5[%c0_12, %c0_13] : memref<1x128xf32, #tpu.memory_space<vmem>>, vector<1x128xf32>
      %22 = vector.broadcast %21 : vector<1x128xf32> to vector<8x128xf32>
      %23 = arith.addf %20, %22 : vector<8x128xf32>
      %c0_14 = arith.constant 0 : index
      %c0_15 = arith.constant 0 : index
      %24 = vector.load %arg6[%c0_14, %c0_15] : memref<8x128xf32, #tpu.memory_space<vmem>>, vector<8x128xf32>
      tpu.vector_store %arg6[%c0_14, %c0_15], %23 {strides = array<i32>} : memref<8x128xf32, #tpu.memory_space<vmem>>, vector<8x128xf32>,
    } else {
    }
    return
  }
  func.func @transform_0(%arg0: i32, %arg1: i32, %arg2: i32) -> (i32, i32) {
    %c0_i32 = arith.constant 0 : i32
    return %arg0, %arg2 : i32, i32
  }
  func.func @transform_1(%arg0: i32, %arg1: i32, %arg2: i32) -> (i32, i32) {
    %c0_i32 = arith.constant 0 : i32
    return %arg2, %arg1 : i32, i32
  }
  func.func @transform_2(%arg0: i32, %arg1: i32, %arg2: i32) -> (i32, i32) {
    %c0_i32 = arith.constant 0 : i32
    %c0_i32_0 = arith.constant 0 : i32
    return %c0_i32, %arg1 : i32, i32
  }
  func.func @transform_3(%arg0: i32, %arg1: i32, %arg2: i32) -> (i32, i32) {
    %c0_i32 = arith.constant 0 : i32
    return %arg0, %arg1 : i32, i32
  }
}

</mosaic_0001>

<bundles_post_ra>
// kernel: tpu_custom_call.1
= control target key start
LH: loop header
LB: loop body
LE: loop exit
PB: predicated region body
PF: predicated region fallthrough
CT: control target
= control target key end

     0   :  { %8 = vsyncpa [#allocation3], 0  ;;  %s714_s0 = inlined_call_operand.hbm [shape: f32[8,128], index: 0, kind: input, shape index: {}]   ;;  %s715_s1 = inlined_call_operand.hbm [shape: f32[128,128], index: 1, kind: input, shape index: {}]   ;;  %s716_s2 = inlined_call_operand.vmem [shape: f32[1,128], index: 2, kind: input, shape index: {}]   ;;  %s717_s3 = inlined_call_operand.hbm [shape: f32[8,128], index: 3, kind: output, shape index: {}]  }
   0x1   :  { %9 = vsyncpa [#allocation6], 0 }
   0x2   :  { %10 = vsyncpa [#allocation4], 0  ;;  %s16_s14 = sshll.u32 %s714_s0, 4  ;;  %s510_s15 = smov [#allocation2]   ;;  %s17_s14 = int_to_ptr.hbm [resolvable:$true] %s16_s14 }
   0x3   :  { %s18_s16 = sshll.u32 %s510_s15, 4  ;;  %s26_s19 = sshll.u32 %s715_s1, 4  ;;  %s19_s16 = int_to_ptr.vmem [resolvable:$true] %s18_s16  ;;  %s27_s19 = int_to_ptr.hbm [resolvable:$true] %s26_s19 }
   0x4   :  { %21 = dma.hbm_to_vmem [thread:$0]  %s17_s14, 128, %s19_s16, [#allocation3]  }
   0x5   :  { %s511_s20 = smov [#allocation5]   ;;  %s512_s22 = smov 128  }
   0x6   :  { %s28_s21 = sshll.u32 %s511_s20, 4  ;;  %s513_s23 = smov 8   ;;  %s29_s21 = int_to_ptr.vmem [resolvable:$true] %s28_s21 }
   0x7   :  { %34 = dma.hbm_to_vmem [thread:$0]  %s27_s19, 2048, %s29_s21, [#allocation6], %s512_s22, %s512_s22, %s513_s23  }
   0x8   :  { %504 = dma.done.wait [#allocation3], 128  }
   0x9   :  { %505 = vsyncadd [#allocation3], 4294967168 }
   0xa   :  { %506 = dma.done.wait [#allocation6], 2048  }
   0xb   :  { %507 = vsyncadd [#allocation6], 4294965248  ;;  %v541_v0 = vld [vmem:[#allocation5 + $0x78] sm:$0xff]  ;;  %v543_v1 = vld [vmem:[#allocation5 + $0x70] sm:$0xff]  ;;  %s514_s24 = smov [#allocation7]   ;;  %s351_s28 = sshll.u32 %s717_s3, 4  ;;  %s352_s28 = int_to_ptr.hbm [resolvable:$true] %s351_s28 }
   0xc   :  { %v545_v2 = vld [vmem:[#allocation5 + $0x68] sm:$0xff]  ;;  %v93_v3 = vand.u32 2147483647, %v541_v0  ;;  %v92_v4 = vand.u32 2147483647, %v543_v1  ;;  %v550_v6 = vld [vmem:[#allocation5 + $0x60] sm:$0xff] }
   0xd   :  { %v91_v5 = vand.u32 2147483647, %v545_v2  ;;  %v552_v7 = vld [vmem:[#allocation5 + $0x58] sm:$0xff]  ;;  %v90_v10 = vand.u32 2147483647, %v550_v6  ;;  %v555_v11 = vld [vmem:[#allocation5 + $0x50] sm:$0xff] }
   0xe   :  { %v109_v8 = vsub.f32 0.0, %v93_v3  ;;  %v108_v9 = vsub.f32 0.0, %v92_v4  ;;  %v89_v13 = vand.u32 2147483647, %v552_v7  ;;  %v558_v14 = vld [vmem:[#allocation5 + $0x48] sm:$0xff]  ;;  %v560_v15 = vld [vmem:[#allocation5 + $0x40] sm:$0xff] }
   0xf   :  { %v107_v12 = vsub.f32 0.0, %v91_v5  ;;  %v106_v18 = vsub.f32 0.0, %v90_v10  ;;  %v77_v19 = vmax.f32 %v541_v0, 0.0  ;;  %v88_v22 = vand.u32 2147483647, %v555_v11  ;;  %v567_v29 = vld [vmem:[#allocation5 + $0x38] sm:$0xff] }
  0x10   :  { %v140_v16 = vmul.f32 1.442695, %v109_v8  ;;  %v138_v17 = vmul.f32 1.442695, %v108_v9  ;;  %v105_v21 = vsub.f32 0.0, %v89_v13  ;;  %v76_v26 = vmax.f32 %v543_v1, 0.0 }
  0x11   :  { %v136_v20 = vmul.f32 1.442695, %v107_v12  ;;  %v134_v23 = vmul.f32 1.442695, %v106_v18  ;;  %v87_v24 = vand.u32 2147483647, %v558_v14 }
  0x12   :  { %368 = vpow2.f32 %v140_v16  ;;  %v86_v25 = vand.u32 2147483647, %v560_v15  ;;  %v132_v27 = vmul.f32 1.442695, %v105_v21  ;;  %v104_v28 = vsub.f32 0.0, %v88_v22  ;;  %v569_v30 = vld [vmem:[#allocation5 + $0x30] sm:$0xff] }
  0x13   :  { %370 = vpow2.f32 %v138_v17  ;;  %v75_v31 = vmax.f32 %v545_v2, 0.0  ;;  %v103_v32 = vsub.f32 0.0, %v87_v24  ;;  %v572_v34 = vld [vmem:[#allocation5 + $0x28] sm:$0xff]  ;;  %v574_v35 = vld [vmem:[#allocation5 + $0x20] sm:$0xff]  ;;  %v85_v37 = vand.u32 2147483647, %v567_v29 }
  0x14   :  { %372 = vpow2.f32 %v136_v20  ;;  %v102_v33 = vsub.f32 0.0, %v86_v25  ;;  %v130_v36 = vmul.f32 1.442695, %v104_v28  ;;  %v84_v38 = vand.u32 2147483647, %v569_v30  ;;  %s349_s25 = sshll.u32 %s514_s24, 4  ;;  %s350_s25 = int_to_ptr.vmem [resolvable:$true] %s349_s25 }
  0x15   :  { %374 = vpow2.f32 %v134_v23  ;;  %v74_v39 = vmax.f32 %v550_v6, 0.0  ;;  %v128_v40 = vmul.f32 1.442695, %v103_v32  ;;  %v73_v42 = vmax.f32 %v552_v7, 0.0 }
  0x16   :  { %376 = vpow2.f32 %v132_v27  ;;  %v126_v41 = vmul.f32 1.442695, %v102_v33  ;;  %v72_v43 = vmax.f32 %v555_v11, 0.0  ;;  %v71_v44 = vmax.f32 %v558_v14, 0.0 }
  0x17   :  { %v83_v45 = vand.u32 2147483647, %v572_v34  ;;  %378 = vpow2.f32 %v130_v36  ;;  %v101_v47 = vsub.f32 0.0, %v85_v37  ;;  %v583_v48 = vsub.f32 0.0, %v84_v38 }
  0x18   :  { %v369_v46 = vpop.eup %368  ;;  %v82_v49 = vand.u32 2147483647, %v574_v35  ;;  %380 = vpow2.f32 %v128_v40 }
  0x19   :  { %v371_v50 = vpop.eup %370  ;;  %v277_v51 = vadd.f32 1.0, %v369_v46  ;;  %v280_v52 = vmul.f32 -0.5, %v369_v46  ;;  %v283_v53 = vand.u32 2147483647, %v369_v46  ;;  %382 = vpow2.f32 %v126_v41 }
  0x1a   :  { %v373_v54 = vpop.eup %372  ;;  %v268_v55 = vadd.f32 1.0, %v371_v50  ;;  %v271_v56 = vmul.f32 -0.5, %v371_v50  ;;  %v274_v57 = vand.u32 2147483647, %v371_v50  ;;  %v586_v61 = vsub.f32 0.0, %v83_v45 }
  0x1b   :  { %v375_v58 = vpop.eup %374  ;;  %384 = vlog2.f32 %v277_v51  ;;  %v281_v59 = vadd.f32 1.0, %v280_v52  ;;  %v259_v60 = vadd.f32 1.0, %v373_v54  ;;  %v262_v3 = vmul.f32 -0.5, %v373_v54 }
  0x1c   :  { %v377_v62 = vpop.eup %376  ;;  %386 = vlog2.f32 %v268_v55  ;;  %v272_v63 = vadd.f32 1.0, %v271_v56  ;;  %v588_v4 = vmul.f32 1.442695, %v101_v47  ;;  %vm590_vm0 = vcmp.lt.f32.partialorder %v283_v53, 0.0004427343 }
  0x1d   :  { %388 = vlog2.f32 %v259_v60  ;;  %v265_v8 = vand.u32 2147483647, %v373_v54  ;;  %v250_v9 = vadd.f32 1.0, %v375_v58  ;;  %v379_v10 = vpop.eup %378  ;;  %vm594_vm1 = vcmp.lt.f32.partialorder %v274_v57, 0.0004427343 }
  0x1e   :  { %v263_v13 = vadd.f32 1.0, %v262_v3  ;;  %v253_v16 = vmul.f32 -0.5, %v375_v58  ;;  %v256_v17 = vand.u32 2147483647, %v375_v58  ;;  %v598_v18 = vpop.eup %380  ;;  %v282_v20 = vmul.f32 %v369_v46, %v281_v59 }
  0x1f   :  { %390 = vlog2.f32 %v250_v9  ;;  %v241_v21 = vadd.f32 1.0, %v377_v62  ;;  %v244_v22 = vmul.f32 -0.5, %v377_v62  ;;  %v600_v23 = vpop.eup %382  ;;  %v273_v24 = vmul.f32 %v371_v50, %v272_v63  ;;  %v626_v9 = vld [vmem:[#allocation5 + $0x18] sm:$0xff] }
  0x20   :  { %vm602_vm2 = vcmp.lt.f32.partialorder %v265_v8, 0.0004427343  ;;  %v254_v27 = vadd.f32 1.0, %v253_v16  ;;  %v247_v28 = vand.u32 2147483647, %v377_v62  ;;  %v232_v36 = vadd.f32 1.0, %v379_v10 }
  0x21   :  { %v385_v32 = vpop.eup %384  ;;  %392 = vlog2.f32 %v241_v21  ;;  %v245_v33 = vadd.f32 1.0, %v244_v22  ;;  %v235_v37 = vmul.f32 -0.5, %v379_v10  ;;  %v264_v41 = vmul.f32 %v373_v54, %v263_v13 }
  0x22   :  { %v387_v38 = vpop.eup %386  ;;  %v279_v40 = vmul.f32 0.6931472, %v385_v32  ;;  %v255_v45 = vmul.f32 %v375_v58, %v254_v27  ;;  %vm606_vm3 = vcmp.lt.f32.partialorder %v256_v17, 0.0004427343  ;;  %vm610_vm4 = vcmp.lt.f32.partialorder %v247_v28, 0.0004427343 }
  0x23   :  { %v389_v47 = vpop.eup %388  ;;  %v270_v50 = vmul.f32 0.6931472, %v387_v38  ;;  %394 = vlog2.f32 %v232_v36  ;;  %v236_v52 = vadd.f32 1.0, %v235_v37  ;;  %v238_v56 = vand.u32 2147483647, %v379_v10 }
  0x24   :  { %v285_v53 = vsel %vm590_vm0, %v282_v20, %v279_v40  ;;  %v261_v55 = vmul.f32 0.6931472, %v389_v47  ;;  %v223_v54 = vadd.f32 1.0, %v598_v18  ;;  %v246_v60 = vmul.f32 %v377_v62, %v245_v33 }
  0x25   :  { %v391_v57 = vpop.eup %390  ;;  %v301_v58 = vadd.f32 %v285_v53, %v77_v19  ;;  %v276_v59 = vsel %vm594_vm1, %v273_v24, %v270_v50  ;;  %v226_v63 = vmul.f32 -0.5, %v598_v18  ;;  %v237_v19 = vmul.f32 %v379_v10, %v236_v52  ;;  %v642_v10 = vld [vmem:[#allocation5 + $0x10] sm:$0xff]  ;;  %v673_v50 = vld [vmem:[#allocation5] sm:$0xff] }
  0x26   :  { %v300_v3 = vadd.f32 %v276_v59, %v76_v26  ;;  %v267_v5 = vsel %vm602_vm2, %v264_v41, %v261_v55  ;;  %v252_v8 = vmul.f32 0.6931472, %v391_v57  ;;  %396 = vlog2.f32 %v223_v54 }
  0x27   :  { %v393_v13 = vpop.eup %392  ;;  %302 = vmatpush.msra.mxu0 %v301_v58  ;;  %v299_v0 = vadd.f32 %v267_v5, %v75_v31  ;;  %v227_v12 = vadd.f32 1.0, %v226_v63  ;;  %v214_v62 = vadd.f32 1.0, %v600_v23  ;;  %v229_v16 = vand.u32 2147483647, %v598_v18 }
  0x28   :  { %v258_v1 = vsel %vm606_vm3, %v255_v45, %v252_v8  ;;  %v243_v26 = vmul.f32 0.6931472, %v393_v13  ;;  %v217_v17 = vmul.f32 -0.5, %v600_v23  ;;  %vm637_vm5 = vcmp.lt.f32.partialorder %v238_v56, 0.0004427343 }
  0x29   :  { %v395_v20 = vpop.eup %394  ;;  %303 = vmatpush.msra.mxu0 %v300_v3  ;;  %v298_v21 = vadd.f32 %v258_v1, %v74_v39  ;;  %398 = vlog2.f32 %v214_v62  ;;  %v81_v31 = vand.u32 2147483647, %v626_v9  ;;  %v220_v27 = vand.u32 2147483647, %v600_v23 }
  0x2a   :  { %v249_v22 = vsel %vm610_vm4, %v246_v60, %v243_v26  ;;  %v234_v24 = vmul.f32 0.6931472, %v395_v20  ;;  %v218_v25 = vadd.f32 1.0, %v217_v17  ;;  %v228_v39 = vmul.f32 %v598_v18, %v227_v12  ;;  %v665_v18 = vld [vmem:[#allocation5 + $0x8] sm:$0xff] }
  0x2b   :  { %304 = vmatpush.msra.mxu0 %v299_v0  ;;  %v297_v6 = vadd.f32 %v249_v22, %v73_v42  ;;  %400 = vpow2.f32 %v588_v4  ;;  %v122_v28 = vmul.f32 1.442695, %v583_v48  ;;  %vm654_vm6 = vcmp.lt.f32.partialorder %v229_v16, 0.0004427343 }
  0x2c   :  { %v397_v32 = vpop.eup %396  ;;  %v240_v33 = vsel %vm637_vm5, %v237_v19, %v234_v24  ;;  %v120_v37 = vmul.f32 1.442695, %v586_v61  ;;  %v80_v38 = vand.u32 2147483647, %v642_v10  ;;  %v219_v48 = vmul.f32 %v600_v23, %v218_v25 }
  0x2d   :  { %305 = vmatpush.msra.mxu0 %v298_v21  ;;  %v296_v7 = vadd.f32 %v240_v33, %v72_v43  ;;  %v225_v42 = vmul.f32 0.6931472, %v397_v32  ;;  %402 = vpow2.f32 %v122_v28  ;;  %v98_v4 = vsub.f32 0.0, %v82_v49 }
  0x2e   :  { %404 = vpow2.f32 %v120_v37  ;;  %v70_v41 = vmax.f32 %v560_v15, 0.0  ;;  %vm221_vm7 = vcmp.lt.f32.partialorder %v220_v27, 0.0004427343  ;;  %v97_v11 = vsub.f32 0.0, %v81_v31 }
  0x2f   :  { %v399_v40 = vpop.eup %398  ;;  %306 = vmatpush.msra.mxu0 %v297_v6  ;;  %v231_v61 = vsel %vm654_vm6, %v228_v39, %v225_v42  ;;  %v118_v23 = vmul.f32 1.442695, %v98_v4  ;;  %v96_v46 = vsub.f32 0.0, %v80_v38  ;;  %v79_v49 = vand.u32 2147483647, %v665_v18 }
  0x30   :  { %v295_v43 = vadd.f32 %v231_v61, %v71_v44  ;;  %v216_v45 = vmul.f32 0.6931472, %v399_v40  ;;  %v116_v56 = vmul.f32 1.442695, %v97_v11  ;;  %v78_v58 = vand.u32 2147483647, %v673_v50 }
  0x31   :  { %v401_v47 = vpop.eup %400  ;;  %307 = vmatpush.msra.mxu0 %v296_v7  ;;  %406 = vpow2.f32 %v118_v23  ;;  %v95_v54 = vsub.f32 0.0, %v79_v49  ;;  %v114_v57 = vmul.f32 1.442695, %v96_v46  ;;  %v69_v26 = vmax.f32 %v567_v29, 0.0 }
  0x32   :  { %v222_v51 = vsel %vm221_vm7, %v219_v48, %v216_v45  ;;  %v205_v52 = vadd.f32 1.0, %v401_v47  ;;  %v208_v53 = vmul.f32 -0.5, %v401_v47  ;;  %v211_v5 = vand.u32 2147483647, %v401_v47 }
  0x33   :  { %v403_v55 = vpop.eup %402  ;;  %308 = vmatpush.msra.mxu0 %v295_v43  ;;  %v294_v15 = vadd.f32 %v222_v51, %v70_v41  ;;  %v112_v8 = vmul.f32 1.442695, %v95_v54  ;;  %v94_v62 = vsub.f32 0.0, %v78_v58  ;;  %v68_v17 = vmax.f32 %v569_v30, 0.0 }
  0x34   :  { %v405_v14 = vpop.eup %404  ;;  %408 = vlog2.f32 %v205_v52  ;;  %v196_v44 = vadd.f32 1.0, %v403_v55  ;;  %v209_v59 = vadd.f32 1.0, %v208_v53  ;;  %v199_v60 = vmul.f32 -0.5, %v403_v55 }
  0x35   :  { %309 = vmatpush.msra.mxu0 %v294_v15  ;;  %v187_v63 = vadd.f32 1.0, %v405_v14  ;;  %v190_v3 = vmul.f32 -0.5, %v405_v14  ;;  %v202_v0 = vand.u32 2147483647, %v403_v55  ;;  %v193_v12 = vand.u32 2147483647, %v405_v14 }
  0x36   :  { %410 = vlog2.f32 %v196_v44  ;;  %v200_v13 = vadd.f32 1.0, %v199_v60  ;;  %v210_v16 = vmul.f32 %v401_v47, %v209_v59  ;;  %vm678_vm8 = vcmp.lt.f32.partialorder %v211_v5, 0.0004427343 }
  0x37   :  { %412 = vlog2.f32 %v187_v63  ;;  %v191_v19 = vadd.f32 1.0, %v190_v3  ;;  %v407_v1 = vpop.eup %406  ;;  %v67_v25 = vmax.f32 %v572_v34, 0.0  ;;  %v110_v27 = vmul.f32 1.442695, %v94_v62 }
  0x38   :  { %414 = vpow2.f32 %v116_v56  ;;  %v178_v2 = vadd.f32 1.0, %v407_v1  ;;  %v181_v31 = vmul.f32 -0.5, %v407_v1  ;;  %v201_v24 = vmul.f32 %v403_v55, %v200_v13 }
  0x39   :  { %416 = vpow2.f32 %v114_v57  ;;  %vm683_vm9 = vcmp.lt.f32.partialorder %v202_v0, 0.0004427343  ;;  %v192_v30 = vmul.f32 %v405_v14, %v191_v19  ;;  %vm687_vm10 = vcmp.lt.f32.partialorder %v193_v12, 0.0004427343 }
  0x3a   :  { %v409_v20 = vpop.eup %408  ;;  %418 = vpow2.f32 %v112_v8  ;;  %v182_v36 = vadd.f32 1.0, %v181_v31  ;;  %v184_v7 = vand.u32 2147483647, %v407_v1  ;;  %v66_v46 = vmax.f32 %v574_v35, 0.0 }
  0x3b   :  { %v207_v22 = vmul.f32 0.6931472, %v409_v20  ;;  %420 = vlog2.f32 %v178_v2  ;;  %v65_v58 = vmax.f32 %v626_v9, 0.0  ;;  %v64_v13 = vmax.f32 %v642_v10, 0.0 }
  0x3c   :  { %v411_v6 = vpop.eup %410  ;;  %422 = vpow2.f32 %v110_v27  ;;  %v183_v47 = vmul.f32 %v407_v1, %v182_v36  ;;  %vm698_vm11 = vcmp.lt.f32.partialorder %v184_v7, 0.0004427343  ;;  %v63_v20 = vmax.f32 %v665_v18, 0.0  ;;  %v367_v18 = vld [vmem:[%s716_s2] ss:$0 sm:$0xff] }
  0x3d   :  { %v413_v28 = vpop.eup %412  ;;  %v213_v32 = vsel %vm678_vm8, %v210_v16, %v207_v22  ;;  %v198_v33 = vmul.f32 0.6931472, %v411_v6 }
  0x3e   :  { %v415_v34 = vpop.eup %414  ;;  %v293_v37 = vadd.f32 %v213_v32, %v69_v26  ;;  %v189_v38 = vmul.f32 0.6931472, %v413_v28  ;;  %v45_v28 = vld [vmem:[#allocation2] sm:$0xff] }
  0x3f   :  { %v417_v42 = vpop.eup %416  ;;  %v204_v48 = vsel %vm683_vm9, %v201_v24, %v198_v33  ;;  %v169_v4 = vadd.f32 1.0, %v415_v34  ;;  %v172_v40 = vmul.f32 -0.5, %v415_v34  ;;  %v175_v56 = vand.u32 2147483647, %v415_v34 }
  0x40   :  { %v419_v61 = vpop.eup %418  ;;  %310 = vmatpush.msra.mxu0 %v293_v37  ;;  %v292_v41 = vadd.f32 %v204_v48, %v68_v17  ;;  %v195_v11 = vsel %vm687_vm10, %v192_v30, %v189_v38  ;;  %v160_v43 = vadd.f32 1.0, %v417_v42  ;;  %v163_v45 = vmul.f32 -0.5, %v417_v42 }
  0x41   :  { %v291_v23 = vadd.f32 %v195_v11, %v67_v25  ;;  %424 = vlog2.f32 %v169_v4  ;;  %v421_v49 = vpop.eup %420  ;;  %v173_v52 = vadd.f32 1.0, %v172_v40  ;;  %v151_v53 = vadd.f32 1.0, %v419_v61 }
  0x42   :  { %311 = vmatpush.msra.mxu0 %v292_v41  ;;  %426 = vlog2.f32 %v160_v43  ;;  %v423_v55 = vpop.eup %422  ;;  %v180_v15 = vmul.f32 0.6931472, %v421_v49  ;;  %v164_v54 = vadd.f32 1.0, %v163_v45  ;;  %v154_v14 = vmul.f32 -0.5, %v419_v61 }
  0x43   :  { %v166_v44 = vand.u32 2147483647, %v417_v42  ;;  %428 = vlog2.f32 %v151_v53  ;;  %v142_v35 = vadd.f32 1.0, %v423_v55  ;;  %v145_v60 = vmul.f32 -0.5, %v423_v55 }
  0x44   :  { %312 = vmatpush.msra.mxu0 %v291_v23  ;;  %v186_v57 = vsel %vm698_vm11, %v183_v47, %v180_v15  ;;  %v155_v59 = vadd.f32 1.0, %v154_v14  ;;  %v174_v3 = vmul.f32 %v415_v34, %v173_v52  ;;  %v157_v5 = vand.u32 2147483647, %v419_v61 }
  0x45   :  { %v290_v63 = vadd.f32 %v186_v57, %v66_v46  ;;  %430 = vlog2.f32 %v142_v35  ;;  %vm176_vm12 = vcmp.lt.f32.partialorder %v175_v56, 0.0004427343  ;;  %v165_v0 = vmul.f32 %v417_v42, %v164_v54 }
  0x46   :  { %v146_v19 = vadd.f32 1.0, %v145_v60  ;;  %vm167_vm13 = vcmp.lt.f32.partialorder %v166_v44, 0.0004427343  ;;  %v148_v1 = vand.u32 2147483647, %v423_v55  ;;  %v156_v16 = vmul.f32 %v419_v61, %v155_v59 }
  0x47   :  { %v425_v8 = vpop.eup %424  ;;  %313 = vmatpush.msra.mxu0 %v290_v63  ;;  %vm158_vm14 = vcmp.lt.f32.partialorder %v157_v5, 0.0004427343  ;;  %v62_v25 = vmax.f32 %v673_v50, 0.0 }
  0x48   :  { %v427_v12 = vpop.eup %426  ;;  %v171_v62 = vmul.f32 0.6931472, %v425_v8  ;;  %v147_v22 = vmul.f32 %v423_v55, %v146_v19  ;;  %vm149_vm15 = vcmp.lt.f32.partialorder %v148_v1, 0.0004427343 }
  0x49   :  { %v162_v26 = vmul.f32 0.6931472, %v427_v12  ;;  %v429_v9 = vpop.eup %428 }
  0x4a   :  { %v177_v17 = vsel %vm176_vm12, %v174_v3, %v171_v62  ;;  %v153_v31 = vmul.f32 0.6931472, %v429_v9 }
  0x4b   :  { %v289_v21 = vadd.f32 %v177_v17, %v65_v58  ;;  %v168_v2 = vsel %vm167_vm13, %v165_v0, %v162_v26  ;;  %v431_v24 = vpop.eup %430 }
  0x4c   :  { %v288_v10 = vadd.f32 %v168_v2, %v64_v13  ;;  %v159_v27 = vsel %vm158_vm14, %v156_v16, %v153_v31  ;;  %v144_v6 = vmul.f32 0.6931472, %v431_v24 }
  0x4d   :  { %314 = vmatpush.msra.mxu0 %v289_v21  ;;  %v287_v29 = vadd.f32 %v159_v27, %v63_v20 }
  0x4e   :  { %v150_v30 = vsel %vm149_vm15, %v147_v22, %v144_v6 }
  0x4f   :  { %315 = vmatpush.msra.mxu0 %v288_v10  ;;  %v286_v39 = vadd.f32 %v150_v30, %v62_v25 }
  0x51   :  { %316 = vmatpush.msra.mxu0 %v287_v29 }
  0x53   :  { %317 = vmatpush.msra.mxu0 %v286_v39 }
  0x54   :  { %318 = vmatmul.f32.vlgmr.msra.gmra.mxu0 %v45_v28 }
  0xd1   :  { %v319_v50 = vpop.f32.mrf.mxu0 }
  0xd2   :  { %v342_v32 = vadd.f32 %v367_v18, %v319_v50 }
  0xd4   :  { %343 = vst [vmem:[#allocation7] sm:$0xff] %v342_v32 }
  0xd5   :  { %354 = dma.vmem_to_hbm [thread:$0]  %s350_s25, 128, %s352_s28, [#allocation4]  }
  0xd6   :  { %508 = dma.done.wait [#allocation4], 128  }
  0xd7   :  { %509 = vsyncadd [#allocation4], 4294967168 }
  0xd8   :  { %359 = vsyncpa [#allocation3], 1 }
  0xd9   :  { %360 = vsyncpa [#allocation6], 1 }
  0xda   :  { %361 = vsyncpa [#allocation4], 1 }

</bundles_post_ra>
